<compile_context>
chip_gen: v7x
topology: tpu7x:2x2x1
jax: 0.10.0
libtpu: 0.0.40
codegen_flags: <defaults>
</compile_context>

<pallas_src>
import functools
import numpy as np
import jax
import jax.numpy as jnp
from jax.experimental import pallas as pl
from jax.experimental.pallas import tpu as pltpu

LANES = 128
BP = 8  # sublane-padded batch (one 8-row sublane tile)


def _lstm_kernel(xf_ref, wih_ref, whh_ref, b_ref, wfc_ref, bfc_ref, y_ref,
                 *, hidden_size, seq_len):
    H, T = hidden_size, seq_len

    # ---- hoisted input projection: single matmul, bias folded in ----------
    # xf: (T*BP, F) time-major, sublane-padded; gx: (T*BP, 4H)
    gx = (jnp.dot(xf_ref[...], wih_ref[...],
                  preferred_element_type=jnp.float32)
          + b_ref[...])

    # ---- recurrence: h/c stay in vregs as full (8, H) slabs, T unrolled ----
    h = jnp.zeros((BP, H), jnp.float32)
    c = jnp.zeros((BP, H), jnp.float32)
    for t in range(T):
        # whh_ref read inside the dot (not hoisted) -> weight-stationary MXU
        gates = gx[t * BP:(t + 1) * BP, :] + jnp.dot(
            h, whh_ref[...], preferred_element_type=jnp.float32)   # (BP, 4H)
        # single full-width EUP pass; g-gate columns were pre-scaled by 2,
        # so tanh(x) = 2*sigmoid(2x) - 1 is just VPU mul/sub afterwards.
        sg = jax.nn.sigmoid(gates)
        i_g = sg[:, 0 * H:1 * H]
        f_g = sg[:, 1 * H:2 * H]
        g_g = sg[:, 2 * H:3 * H] * 2.0 - 1.0
        o_g = sg[:, 3 * H:4 * H]
        c = f_g * c + i_g * g_g
        h = o_g * jnp.tanh(c)

    # ---- fc head on last hidden state (lane-dense padded output block) ----
    y_ref[...] = (jnp.dot(h, wfc_ref[...],
                          preferred_element_type=jnp.float32)
                  + bfc_ref[...])


def lstm_model_forward(x, params):
    """x: (B, T, F) float32. Returns (B, 1) float32."""
    B, T, F = x.shape
    H = params["w_hh"].shape[1]
    assert B <= BP

    # time-major, sublane-padded flatten: row t*BP + b <-> (time t, batch b);
    # rows b >= B of each 8-row group are zero (finite garbage, never read).
    xt = jnp.transpose(x, (1, 0, 2))                            # (T, B, F)
    xt = jnp.concatenate(
        [xt, jnp.zeros((T, BP - B, F), jnp.float32)], axis=1)   # (T, BP, F)
    xf = xt.reshape(T * BP, F)                                  # (T*BP, F)

    # fold the 2x g-gate scale (tanh-as-sigmoid rewrite) into the weights/bias
    gscale = jnp.ones((1, 4 * H), jnp.float32).at[:, 2 * H:3 * H].set(2.0)
    wih_t = jnp.transpose(params["w_ih"], (1, 0)) * gscale      # (F, 4H)
    whh_t = jnp.transpose(params["w_hh"], (1, 0)) * gscale      # (H, 4H)
    b = (params["b_ih"] + params["b_hh"]).reshape(1, 4 * H) * gscale

    # lane-pad fc weight / bias so the kernel writes a 128-lane-dense block
    wfc_pad = jnp.zeros((H, LANES), jnp.float32).at[:, 0:1].set(
        jnp.transpose(params["w_fc"], (1, 0)))                  # (H, 128)
    bfc_pad = jnp.zeros((1, LANES), jnp.float32).at[:, 0:1].set(
        params["b_fc"].reshape(1, 1))                           # (1, 128)

    # latency-bound: tiny flops/bytes, hint XLA to schedule tightly around it
    flops = 2 * T * BP * 4 * H * (F + H) + 2 * BP * H * LANES
    transcendentals = T * BP * (4 * H + H)
    bytes_accessed = 4 * (T * BP * F + F * 4 * H + H * 4 * H + 4 * H
                          + H * LANES + LANES + BP * LANES)
    cost = pl.CostEstimate(flops=flops, transcendentals=transcendentals,
                           bytes_accessed=bytes_accessed)

    kernel = functools.partial(_lstm_kernel, hidden_size=H, seq_len=T)
    vmem = pltpu.MemorySpace.VMEM
    out = pl.pallas_call(
        kernel,
        out_shape=jax.ShapeDtypeStruct((BP, LANES), jnp.float32),
        in_specs=[pl.BlockSpec(memory_space=vmem)] * 6,
        out_specs=pl.BlockSpec(memory_space=vmem),
        cost_estimate=cost,
    )(xf, wih_t, whh_t, b, wfc_pad, bfc_pad)
    return out[:B, 0:1]


def _reference(x, params):
    """Pure-JAX reference of the PyTorch forward."""
    B, T, F = x.shape
    H = params["w_hh"].shape[1]
    h = jnp.zeros((B, H), jnp.float32)
    c = jnp.zeros((B, H), jnp.float32)
    for t in range(T):
        g = (x[:, t, :] @ params["w_ih"].T + h @ params["w_hh"].T
             + params["b_ih"] + params["b_hh"])
        i = jax.nn.sigmoid(g[:, 0 * H:1 * H])
        f = jax.nn.sigmoid(g[:, 1 * H:2 * H])
        gg = jnp.tanh(g[:, 2 * H:3 * H])
        o = jax.nn.sigmoid(g[:, 3 * H:4 * H])
        c = f * c + i * gg
        h = o * jnp.tanh(c)
    return h @ params["w_fc"].T + params["b_fc"]


if __name__ == "__main__":
    # module: input_size = len(['temperatura','publicidad','dia_semana']) = 3
    B, T, F, H = 2, 8, 3, 64

    key = jax.random.PRNGKey(0)
    ks = jax.random.split(key, 8)
    scale = 1.0 / np.sqrt(H)  # PyTorch LSTM/Linear default uniform bound
    params = {
        "w_ih": jax.random.uniform(ks[0], (4 * H, F), jnp.float32, -scale, scale),
        "w_hh": jax.random.uniform(ks[1], (4 * H, H), jnp.float32, -scale, scale),
        "b_ih": jax.random.uniform(ks[2], (4 * H,), jnp.float32, -scale, scale),
        "b_hh": jax.random.uniform(ks[3], (4 * H,), jnp.float32, -scale, scale),
        "w_fc": jax.random.uniform(ks[4], (1, H), jnp.float32, -scale, scale),
        "b_fc": jax.random.uniform(ks[5], (1,), jnp.float32, -scale, scale),
    }
    x = jax.random.normal(ks[6], (B, T, F), jnp.float32)

    y = lstm_model_forward(x, params)
    y = jax.block_until_ready(y)

    y_ref = _reference(x, params)
    assert y.shape == (B, 1)
    np.testing.assert_allclose(np.asarray(y), np.asarray(y_ref),
                               rtol=1e-5, atol=1e-5)
    print("KERNEL_OK")
</pallas_src>

<mosaic_0001>
module attributes {stable_mosaic.version = 11 : i64} {
  func.func @_lstm_kernel(%arg0: memref<64x3xf32, #tpu.memory_space<vmem>>, %arg1: memref<3x256xf32, #tpu.memory_space<vmem>>, %arg2: memref<64x256xf32, #tpu.memory_space<vmem>>, %arg3: memref<1x256xf32, #tpu.memory_space<vmem>>, %arg4: memref<64x128xf32, #tpu.memory_space<vmem>>, %arg5: memref<1x128xf32, #tpu.memory_space<vmem>>, %arg6: memref<8x128xf32, #tpu.memory_space<vmem>>) attributes {dimension_semantics = [], scalar_prefetch = 0 : i64, scratch_operands = 0 : i64, tpu.core_type = #tpu.core_type<tc>} {
    %c0 = arith.constant 0 : index
    %c0_0 = arith.constant 0 : index
    %0 = vector.load %arg0[%c0, %c0_0] : memref<64x3xf32, #tpu.memory_space<vmem>>, vector<64x3xf32>
    %c0_1 = arith.constant 0 : index
    %c0_2 = arith.constant 0 : index
    %1 = vector.load %arg1[%c0_1, %c0_2] : memref<3x256xf32, #tpu.memory_space<vmem>>, vector<3x256xf32>
    %cst = arith.constant dense<0.000000e+00> : vector<64x256xf32>
    %2 = tpu.matmul %0, %1, %cst {dimension_numbers = #tpu.dot_dimension_numbers<[1], [0], [0], [1], [0, 0, 1, 1], [], []>} : vector<64x3xf32>, vector<3x256xf32>, vector<64x256xf32> -> vector<64x256xf32>
    %c0_3 = arith.constant 0 : index
    %c0_4 = arith.constant 0 : index
    %3 = vector.load %arg3[%c0_3, %c0_4] : memref<1x256xf32, #tpu.memory_space<vmem>>, vector<1x256xf32>
    %4 = vector.broadcast %3 : vector<1x256xf32> to vector<64x256xf32>
    %5 = arith.addf %2, %4 : vector<64x256xf32>
    %cst_5 = arith.constant 0.000000e+00 : f32
    %6 = vector.broadcast %cst_5 : f32 to vector<8x64xf32>
    %cst_6 = arith.constant 0.000000e+00 : f32
    %7 = vector.broadcast %cst_6 : f32 to vector<8x64xf32>
    %8 = vector.extract_strided_slice %5 {offsets = [0, 0], sizes = [8, 256], strides = [1, 1]} : vector<64x256xf32> to vector<8x256xf32>
    %c0_7 = arith.constant 0 : index
    %c0_8 = arith.constant 0 : index
    %9 = vector.load %arg2[%c0_7, %c0_8] : memref<64x256xf32, #tpu.memory_space<vmem>>, vector<64x256xf32>
    %cst_9 = arith.constant dense<0.000000e+00> : vector<8x256xf32>
    %10 = tpu.matmul %6, %9, %cst_9 {dimension_numbers = #tpu.dot_dimension_numbers<[1], [0], [0], [1], [0, 0, 1, 1], [], []>} : vector<8x64xf32>, vector<64x256xf32>, vector<8x256xf32> -> vector<8x256xf32>
    %11 = arith.addf %8, %10 : vector<8x256xf32>
    %12 = arith.negf %11 : vector<8x256xf32>
    %13 = math.exp %12 : vector<8x256xf32>
    %cst_10 = arith.constant 1.000000e+00 : f32
    %14 = vector.broadcast %cst_10 : f32 to vector<8x256xf32>
    %15 = arith.addf %14, %13 : vector<8x256xf32>
    %16 = arith.divf %14, %15 : vector<8x256xf32>
    %17 = vector.extract_strided_slice %16 {offsets = [0, 0], sizes = [8, 64], strides = [1, 1]} : vector<8x256xf32> to vector<8x64xf32>
    %18 = vector.extract_strided_slice %16 {offsets = [0, 64], sizes = [8, 64], strides = [1, 1]} : vector<8x256xf32> to vector<8x64xf32>
    %19 = vector.extract_strided_slice %16 {offsets = [0, 128], sizes = [8, 64], strides = [1, 1]} : vector<8x256xf32> to vector<8x64xf32>
    %cst_11 = arith.constant 2.000000e+00 : f32
    %20 = vector.broadcast %cst_11 : f32 to vector<8x64xf32>
    %21 = arith.mulf %19, %20 : vector<8x64xf32>
    %cst_12 = arith.constant 1.000000e+00 : f32
    %22 = vector.broadcast %cst_12 : f32 to vector<8x64xf32>
    %23 = arith.subf %21, %22 : vector<8x64xf32>
    %24 = vector.extract_strided_slice %16 {offsets = [0, 192], sizes = [8, 64], strides = [1, 1]} : vector<8x256xf32> to vector<8x64xf32>
    %25 = arith.mulf %18, %7 : vector<8x64xf32>
    %26 = arith.mulf %17, %23 : vector<8x64xf32>
    %27 = arith.addf %25, %26 : vector<8x64xf32>
    %28 = math.tanh %27 : vector<8x64xf32>
    %29 = arith.mulf %24, %28 : vector<8x64xf32>
    %30 = vector.extract_strided_slice %5 {offsets = [8, 0], sizes = [8, 256], strides = [1, 1]} : vector<64x256xf32> to vector<8x256xf32>
    %c0_13 = arith.constant 0 : index
    %c0_14 = arith.constant 0 : index
    %31 = vector.load %arg2[%c0_13, %c0_14] : memref<64x256xf32, #tpu.memory_space<vmem>>, vector<64x256xf32>
    %cst_15 = arith.constant dense<0.000000e+00> : vector<8x256xf32>
    %32 = tpu.matmul %29, %31, %cst_15 {dimension_numbers = #tpu.dot_dimension_numbers<[1], [0], [0], [1], [0, 0, 1, 1], [], []>} : vector<8x64xf32>, vector<64x256xf32>, vector<8x256xf32> -> vector<8x256xf32>
    %33 = arith.addf %30, %32 : vector<8x256xf32>
    %34 = arith.negf %33 : vector<8x256xf32>
    %35 = math.exp %34 : vector<8x256xf32>
    %cst_16 = arith.constant 1.000000e+00 : f32
    %36 = vector.broadcast %cst_16 : f32 to vector<8x256xf32>
    %37 = arith.addf %36, %35 : vector<8x256xf32>
    %38 = arith.divf %36, %37 : vector<8x256xf32>
    %39 = vector.extract_strided_slice %38 {offsets = [0, 0], sizes = [8, 64], strides = [1, 1]} : vector<8x256xf32> to vector<8x64xf32>
    %40 = vector.extract_strided_slice %38 {offsets = [0, 64], sizes = [8, 64], strides = [1, 1]} : vector<8x256xf32> to vector<8x64xf32>
    %41 = vector.extract_strided_slice %38 {offsets = [0, 128], sizes = [8, 64], strides = [1, 1]} : vector<8x256xf32> to vector<8x64xf32>
    %cst_17 = arith.constant 2.000000e+00 : f32
    %42 = vector.broadcast %cst_17 : f32 to vector<8x64xf32>
    %43 = arith.mulf %41, %42 : vector<8x64xf32>
    %cst_18 = arith.constant 1.000000e+00 : f32
    %44 = vector.broadcast %cst_18 : f32 to vector<8x64xf32>
    %45 = arith.subf %43, %44 : vector<8x64xf32>
    %46 = vector.extract_strided_slice %38 {offsets = [0, 192], sizes = [8, 64], strides = [1, 1]} : vector<8x256xf32> to vector<8x64xf32>
    %47 = arith.mulf %40, %27 : vector<8x64xf32>
    %48 = arith.mulf %39, %45 : vector<8x64xf32>
    %49 = arith.addf %47, %48 : vector<8x64xf32>
    %50 = math.tanh %49 : vector<8x64xf32>
    %51 = arith.mulf %46, %50 : vector<8x64xf32>
    %52 = vector.extract_strided_slice %5 {offsets = [16, 0], sizes = [8, 256], strides = [1, 1]} : vector<64x256xf32> to vector<8x256xf32>
    %c0_19 = arith.constant 0 : index
    %c0_20 = arith.constant 0 : index
    %53 = vector.load %arg2[%c0_19, %c0_20] : memref<64x256xf32, #tpu.memory_space<vmem>>, vector<64x256xf32>
    %cst_21 = arith.constant dense<0.000000e+00> : vector<8x256xf32>
    %54 = tpu.matmul %51, %53, %cst_21 {dimension_numbers = #tpu.dot_dimension_numbers<[1], [0], [0], [1], [0, 0, 1, 1], [], []>} : vector<8x64xf32>, vector<64x256xf32>, vector<8x256xf32> -> vector<8x256xf32>
    %55 = arith.addf %52, %54 : vector<8x256xf32>
    %56 = arith.negf %55 : vector<8x256xf32>
    %57 = math.exp %56 : vector<8x256xf32>
    %cst_22 = arith.constant 1.000000e+00 : f32
    %58 = vector.broadcast %cst_22 : f32 to vector<8x256xf32>
    %59 = arith.addf %58, %57 : vector<8x256xf32>
    %60 = arith.divf %58, %59 : vector<8x256xf32>
    %61 = vector.extract_strided_slice %60 {offsets = [0, 0], sizes = [8, 64], strides = [1, 1]} : vector<8x256xf32> to vector<8x64xf32>
    %62 = vector.extract_strided_slice %60 {offsets = [0, 64], sizes = [8, 64], strides = [1, 1]} : vector<8x256xf32> to vector<8x64xf32>
    %63 = vector.extract_strided_slice %60 {offsets = [0, 128], sizes = [8, 64], strides = [1, 1]} : vector<8x256xf32> to vector<8x64xf32>
    %cst_23 = arith.constant 2.000000e+00 : f32
    %64 = vector.broadcast %cst_23 : f32 to vector<8x64xf32>
    %65 = arith.mulf %63, %64 : vector<8x64xf32>
    %cst_24 = arith.constant 1.000000e+00 : f32
    %66 = vector.broadcast %cst_24 : f32 to vector<8x64xf32>
    %67 = arith.subf %65, %66 : vector<8x64xf32>
    %68 = vector.extract_strided_slice %60 {offsets = [0, 192], sizes = [8, 64], strides = [1, 1]} : vector<8x256xf32> to vector<8x64xf32>
    %69 = arith.mulf %62, %49 : vector<8x64xf32>
    %70 = arith.mulf %61, %67 : vector<8x64xf32>
    %71 = arith.addf %69, %70 : vector<8x64xf32>
    %72 = math.tanh %71 : vector<8x64xf32>
    %73 = arith.mulf %68, %72 : vector<8x64xf32>
    %74 = vector.extract_strided_slice %5 {offsets = [24, 0], sizes = [8, 256], strides = [1, 1]} : vector<64x256xf32> to vector<8x256xf32>
    %c0_25 = arith.constant 0 : index
    %c0_26 = arith.constant 0 : index
    %75 = vector.load %arg2[%c0_25, %c0_26] : memref<64x256xf32, #tpu.memory_space<vmem>>, vector<64x256xf32>
    %cst_27 = arith.constant dense<0.000000e+00> : vector<8x256xf32>
    %76 = tpu.matmul %73, %75, %cst_27 {dimension_numbers = #tpu.dot_dimension_numbers<[1], [0], [0], [1], [0, 0, 1, 1], [], []>} : vector<8x64xf32>, vector<64x256xf32>, vector<8x256xf32> -> vector<8x256xf32>
    %77 = arith.addf %74, %76 : vector<8x256xf32>
    %78 = arith.negf %77 : vector<8x256xf32>
    %79 = math.exp %78 : vector<8x256xf32>
    %cst_28 = arith.constant 1.000000e+00 : f32
    %80 = vector.broadcast %cst_28 : f32 to vector<8x256xf32>
    %81 = arith.addf %80, %79 : vector<8x256xf32>
    %82 = arith.divf %80, %81 : vector<8x256xf32>
    %83 = vector.extract_strided_slice %82 {offsets = [0, 0], sizes = [8, 64], strides = [1, 1]} : vector<8x256xf32> to vector<8x64xf32>
    %84 = vector.extract_strided_slice %82 {offsets = [0, 64], sizes = [8, 64], strides = [1, 1]} : vector<8x256xf32> to vector<8x64xf32>
    %85 = vector.extract_strided_slice %82 {offsets = [0, 128], sizes = [8, 64], strides = [1, 1]} : vector<8x256xf32> to vector<8x64xf32>
    %cst_29 = arith.constant 2.000000e+00 : f32
    %86 = vector.broadcast %cst_29 : f32 to vector<8x64xf32>
    %87 = arith.mulf %85, %86 : vector<8x64xf32>
    %cst_30 = arith.constant 1.000000e+00 : f32
    %88 = vector.broadcast %cst_30 : f32 to vector<8x64xf32>
    %89 = arith.subf %87, %88 : vector<8x64xf32>
    %90 = vector.extract_strided_slice %82 {offsets = [0, 192], sizes = [8, 64], strides = [1, 1]} : vector<8x256xf32> to vector<8x64xf32>
    %91 = arith.mulf %84, %71 : vector<8x64xf32>
    %92 = arith.mulf %83, %89 : vector<8x64xf32>
    %93 = arith.addf %91, %92 : vector<8x64xf32>
    %94 = math.tanh %93 : vector<8x64xf32>
    %95 = arith.mulf %90, %94 : vector<8x64xf32>
    %96 = vector.extract_strided_slice %5 {offsets = [32, 0], sizes = [8, 256], strides = [1, 1]} : vector<64x256xf32> to vector<8x256xf32>
    %c0_31 = arith.constant 0 : index
    %c0_32 = arith.constant 0 : index
    %97 = vector.load %arg2[%c0_31, %c0_32] : memref<64x256xf32, #tpu.memory_space<vmem>>, vector<64x256xf32>
    %cst_33 = arith.constant dense<0.000000e+00> : vector<8x256xf32>
    %98 = tpu.matmul %95, %97, %cst_33 {dimension_numbers = #tpu.dot_dimension_numbers<[1], [0], [0], [1], [0, 0, 1, 1], [], []>} : vector<8x64xf32>, vector<64x256xf32>, vector<8x256xf32> -> vector<8x256xf32>
    %99 = arith.addf %96, %98 : vector<8x256xf32>
    %100 = arith.negf %99 : vector<8x256xf32>
    %101 = math.exp %100 : vector<8x256xf32>
    %cst_34 = arith.constant 1.000000e+00 : f32
    %102 = vector.broadcast %cst_34 : f32 to vector<8x256xf32>
    %103 = arith.addf %102, %101 : vector<8x256xf32>
    %104 = arith.divf %102, %103 : vector<8x256xf32>
    %105 = vector.extract_strided_slice %104 {offsets = [0, 0], sizes = [8, 64], strides = [1, 1]} : vector<8x256xf32> to vector<8x64xf32>
    %106 = vector.extract_strided_slice %104 {offsets = [0, 64], sizes = [8, 64], strides = [1, 1]} : vector<8x256xf32> to vector<8x64xf32>
    %107 = vector.extract_strided_slice %104 {offsets = [0, 128], sizes = [8, 64], strides = [1, 1]} : vector<8x256xf32> to vector<8x64xf32>
    %cst_35 = arith.constant 2.000000e+00 : f32
    %108 = vector.broadcast %cst_35 : f32 to vector<8x64xf32>
    %109 = arith.mulf %107, %108 : vector<8x64xf32>
    %cst_36 = arith.constant 1.000000e+00 : f32
    %110 = vector.broadcast %cst_36 : f32 to vector<8x64xf32>
    %111 = arith.subf %109, %110 : vector<8x64xf32>
    %112 = vector.extract_strided_slice %104 {offsets = [0, 192], sizes = [8, 64], strides = [1, 1]} : vector<8x256xf32> to vector<8x64xf32>
    %113 = arith.mulf %106, %93 : vector<8x64xf32>
    %114 = arith.mulf %105, %111 : vector<8x64xf32>
    %115 = arith.addf %113, %114 : vector<8x64xf32>
    %116 = math.tanh %115 : vector<8x64xf32>
    %117 = arith.mulf %112, %116 : vector<8x64xf32>
    %118 = vector.extract_strided_slice %5 {offsets = [40, 0], sizes = [8, 256], strides = [1, 1]} : vector<64x256xf32> to vector<8x256xf32>
    %c0_37 = arith.constant 0 : index
    %c0_38 = arith.constant 0 : index
    %119 = vector.load %arg2[%c0_37, %c0_38] : memref<64x256xf32, #tpu.memory_space<vmem>>, vector<64x256xf32>
    %cst_39 = arith.constant dense<0.000000e+00> : vector<8x256xf32>
    %120 = tpu.matmul %117, %119, %cst_39 {dimension_numbers = #tpu.dot_dimension_numbers<[1], [0], [0], [1], [0, 0, 1, 1], [], []>} : vector<8x64xf32>, vector<64x256xf32>, vector<8x256xf32> -> vector<8x256xf32>
    %121 = arith.addf %118, %120 : vector<8x256xf32>
    %122 = arith.negf %121 : vector<8x256xf32>
    %123 = math.exp %122 : vector<8x256xf32>
    %cst_40 = arith.constant 1.000000e+00 : f32
    %124 = vector.broadcast %cst_40 : f32 to vector<8x256xf32>
    %125 = arith.addf %124, %123 : vector<8x256xf32>
    %126 = arith.divf %124, %125 : vector<8x256xf32>
    %127 = vector.extract_strided_slice %126 {offsets = [0, 0], sizes = [8, 64], strides = [1, 1]} : vector<8x256xf32> to vector<8x64xf32>
    %128 = vector.extract_strided_slice %126 {offsets = [0, 64], sizes = [8, 64], strides = [1, 1]} : vector<8x256xf32> to vector<8x64xf32>
    %129 = vector.extract_strided_slice %126 {offsets = [0, 128], sizes = [8, 64], strides = [1, 1]} : vector<8x256xf32> to vector<8x64xf32>
    %cst_41 = arith.constant 2.000000e+00 : f32
    %130 = vector.broadcast %cst_41 : f32 to vector<8x64xf32>
    %131 = arith.mulf %129, %130 : vector<8x64xf32>
    %cst_42 = arith.constant 1.000000e+00 : f32
    %132 = vector.broadcast %cst_42 : f32 to vector<8x64xf32>
    %133 = arith.subf %131, %132 : vector<8x64xf32>
    %134 = vector.extract_strided_slice %126 {offsets = [0, 192], sizes = [8, 64], strides = [1, 1]} : vector<8x256xf32> to vector<8x64xf32>
    %135 = arith.mulf %128, %115 : vector<8x64xf32>
    %136 = arith.mulf %127, %133 : vector<8x64xf32>
    %137 = arith.addf %135, %136 : vector<8x64xf32>
    %138 = math.tanh %137 : vector<8x64xf32>
    %139 = arith.mulf %134, %138 : vector<8x64xf32>
    %140 = vector.extract_strided_slice %5 {offsets = [48, 0], sizes = [8, 256], strides = [1, 1]} : vector<64x256xf32> to vector<8x256xf32>
    %c0_43 = arith.constant 0 : index
    %c0_44 = arith.constant 0 : index
    %141 = vector.load %arg2[%c0_43, %c0_44] : memref<64x256xf32, #tpu.memory_space<vmem>>, vector<64x256xf32>
    %cst_45 = arith.constant dense<0.000000e+00> : vector<8x256xf32>
    %142 = tpu.matmul %139, %141, %cst_45 {dimension_numbers = #tpu.dot_dimension_numbers<[1], [0], [0], [1], [0, 0, 1, 1], [], []>} : vector<8x64xf32>, vector<64x256xf32>, vector<8x256xf32> -> vector<8x256xf32>
    %143 = arith.addf %140, %142 : vector<8x256xf32>
    %144 = arith.negf %143 : vector<8x256xf32>
    %145 = math.exp %144 : vector<8x256xf32>
    %cst_46 = arith.constant 1.000000e+00 : f32
    %146 = vector.broadcast %cst_46 : f32 to vector<8x256xf32>
    %147 = arith.addf %146, %145 : vector<8x256xf32>
    %148 = arith.divf %146, %147 : vector<8x256xf32>
    %149 = vector.extract_strided_slice %148 {offsets = [0, 0], sizes = [8, 64], strides = [1, 1]} : vector<8x256xf32> to vector<8x64xf32>
    %150 = vector.extract_strided_slice %148 {offsets = [0, 64], sizes = [8, 64], strides = [1, 1]} : vector<8x256xf32> to vector<8x64xf32>
    %151 = vector.extract_strided_slice %148 {offsets = [0, 128], sizes = [8, 64], strides = [1, 1]} : vector<8x256xf32> to vector<8x64xf32>
    %cst_47 = arith.constant 2.000000e+00 : f32
    %152 = vector.broadcast %cst_47 : f32 to vector<8x64xf32>
    %153 = arith.mulf %151, %152 : vector<8x64xf32>
    %cst_48 = arith.constant 1.000000e+00 : f32
    %154 = vector.broadcast %cst_48 : f32 to vector<8x64xf32>
    %155 = arith.subf %153, %154 : vector<8x64xf32>
    %156 = vector.extract_strided_slice %148 {offsets = [0, 192], sizes = [8, 64], strides = [1, 1]} : vector<8x256xf32> to vector<8x64xf32>
    %157 = arith.mulf %150, %137 : vector<8x64xf32>
    %158 = arith.mulf %149, %155 : vector<8x64xf32>
    %159 = arith.addf %157, %158 : vector<8x64xf32>
    %160 = math.tanh %159 : vector<8x64xf32>
    %161 = arith.mulf %156, %160 : vector<8x64xf32>
    %162 = vector.extract_strided_slice %5 {offsets = [56, 0], sizes = [8, 256], strides = [1, 1]} : vector<64x256xf32> to vector<8x256xf32>
    %c0_49 = arith.constant 0 : index
    %c0_50 = arith.constant 0 : index
    %163 = vector.load %arg2[%c0_49, %c0_50] : memref<64x256xf32, #tpu.memory_space<vmem>>, vector<64x256xf32>
    %cst_51 = arith.constant dense<0.000000e+00> : vector<8x256xf32>
    %164 = tpu.matmul %161, %163, %cst_51 {dimension_numbers = #tpu.dot_dimension_numbers<[1], [0], [0], [1], [0, 0, 1, 1], [], []>} : vector<8x64xf32>, vector<64x256xf32>, vector<8x256xf32> -> vector<8x256xf32>
    %165 = arith.addf %162, %164 : vector<8x256xf32>
    %166 = arith.negf %165 : vector<8x256xf32>
    %167 = math.exp %166 : vector<8x256xf32>
    %cst_52 = arith.constant 1.000000e+00 : f32
    %168 = vector.broadcast %cst_52 : f32 to vector<8x256xf32>
    %169 = arith.addf %168, %167 : vector<8x256xf32>
    %170 = arith.divf %168, %169 : vector<8x256xf32>
    %171 = vector.extract_strided_slice %170 {offsets = [0, 0], sizes = [8, 64], strides = [1, 1]} : vector<8x256xf32> to vector<8x64xf32>
    %172 = vector.extract_strided_slice %170 {offsets = [0, 64], sizes = [8, 64], strides = [1, 1]} : vector<8x256xf32> to vector<8x64xf32>
    %173 = vector.extract_strided_slice %170 {offsets = [0, 128], sizes = [8, 64], strides = [1, 1]} : vector<8x256xf32> to vector<8x64xf32>
    %cst_53 = arith.constant 2.000000e+00 : f32
    %174 = vector.broadcast %cst_53 : f32 to vector<8x64xf32>
    %175 = arith.mulf %173, %174 : vector<8x64xf32>
    %cst_54 = arith.constant 1.000000e+00 : f32
    %176 = vector.broadcast %cst_54 : f32 to vector<8x64xf32>
    %177 = arith.subf %175, %176 : vector<8x64xf32>
    %178 = vector.extract_strided_slice %170 {offsets = [0, 192], sizes = [8, 64], strides = [1, 1]} : vector<8x256xf32> to vector<8x64xf32>
    %179 = arith.mulf %172, %159 : vector<8x64xf32>
    %180 = arith.mulf %171, %177 : vector<8x64xf32>
    %181 = arith.addf %179, %180 : vector<8x64xf32>
    %182 = math.tanh %181 : vector<8x64xf32>
    %183 = arith.mulf %178, %182 : vector<8x64xf32>
    %c0_55 = arith.constant 0 : index
    %c0_56 = arith.constant 0 : index
    %184 = vector.load %arg4[%c0_55, %c0_56] : memref<64x128xf32, #tpu.memory_space<vmem>>, vector<64x128xf32>
    %cst_57 = arith.constant dense<0.000000e+00> : vector<8x128xf32>
    %185 = tpu.matmul %183, %184, %cst_57 {dimension_numbers = #tpu.dot_dimension_numbers<[1], [0], [0], [1], [0, 0, 1, 1], [], []>} : vector<8x64xf32>, vector<64x128xf32>, vector<8x128xf32> -> vector<8x128xf32>
    %c0_58 = arith.constant 0 : index
    %c0_59 = arith.constant 0 : index
    %186 = vector.load %arg5[%c0_58, %c0_59] : memref<1x128xf32, #tpu.memory_space<vmem>>, vector<1x128xf32>
    %187 = vector.broadcast %186 : vector<1x128xf32> to vector<8x128xf32>
    %188 = arith.addf %185, %187 : vector<8x128xf32>
    %c0_60 = arith.constant 0 : index
    %c0_61 = arith.constant 0 : index
    %189 = vector.load %arg6[%c0_60, %c0_61] : memref<8x128xf32, #tpu.memory_space<vmem>>, vector<8x128xf32>
    tpu.vector_store %arg6[%c0_60, %c0_61], %188 {strides = array<i32>} : memref<8x128xf32, #tpu.memory_space<vmem>>, vector<8x128xf32>,
    return
  }
}

</mosaic_0001>

<bundles_post_ra>
// kernel: tpu_custom_call.1
= control target key start
LH: loop header
LB: loop body
LE: loop exit
PB: predicated region body
PF: predicated region fallthrough
CT: control target
= control target key end

     0   :  { %11 = vsyncpa [#allocation3], 0  ;;  %s1817_s0 = inlined_call_operand.vmem [shape: f32[64,3], index: 0, kind: input, shape index: {}]   ;;  %s1818_s1 = inlined_call_operand.vmem [shape: f32[3,256], index: 1, kind: input, shape index: {}]   ;;  %s1819_s2 = inlined_call_operand.hbm [shape: f32[64,256], index: 2, kind: input, shape index: {}]   ;;  %s1820_s3 = inlined_call_operand.vmem [shape: f32[1,256], index: 3, kind: input, shape index: {}]   ;;  %s1821_s4 = inlined_call_operand.vmem [shape: f32[64,128], index: 4, kind: input, shape index: {}]   ;;  %s1822_s5 = inlined_call_operand.vmem [shape: f32[1,128], index: 5, kind: input, shape index: {}]   ;;  %s1823_s6 = inlined_call_operand.hbm [shape: f32[8,128], index: 6, kind: output, shape index: {}]  }
   0x1   :  { %12 = vsyncpa [#allocation4], 0  ;;  %s1513_s21 = smov [#allocation2]   ;;  %s1465_s25 = scalar_lea.hbm %s1819_s2, 2048 }
   0x2   :  { %s22_s22 = sshll.u32 %s1513_s21, 4  ;;  %p1466_p0 = scmp.ne.s32.totalorder %s1819_s2, %s1465_s25  ;;  %s23_s22 = int_to_ptr.vmem [resolvable:$true] %s22_s22 }
   0x3   :  { %p1469_p1 = scmp.lt.u32.totalorder %s1465_s25, %s1819_s2 }
   0x5   :  { %p1471_p2 = pnand %p1469_p1, %p1466_p0 }
   0x7   :  { %1474 = shalt.err (!%p1471_p2)
}
   0x8   :  { %s1475_s30 = scalar_lea.vmem %s23_s22, 2048  ;;  %p1480_p4 = scmp.lt.s32.totalorder %s23_s22, %s23_s22 }
   0x9   :  { %p1476_p3 = scmp.ne.s32.totalorder %s23_s22, %s1475_s30  ;;  %p1481_p5 = scmp.lt.s32.totalorder %s1475_s30, %s1475_s30 }
   0xb   :  { %p1482_p6 = por %p1481_p5, %p1480_p4 }
   0xd   :  { %p1483_p7 = pnand %p1482_p6, %p1476_p3 }
   0xf   :  { %1486 = shalt.err (!%p1483_p7)
}
  0x10   :  { %s1514_s7 = smov 256   ;;  %s1515_s8 = smov 16  }
  0x11   :  { %28 = dma.hbm_to_vmem [thread:$0]  %s1819_s2, 2048, %s23_s22, [#allocation3], %s1514_s7, %s1514_s7, %s1515_s8  }
  0x12   :  { %1509 = dma.done.wait [#allocation3], 2048  }
  0x13   :  { %1510 = vsyncadd [#allocation3], 4294965248  ;;  %v1516_v0 = vmov 0.0   ;;  %v46_v1 = vld [vmem:[%s1818_s1] sm:$0x77]  ;;  %vm86_vm0 = vcmask 1042432   ;;  %v49_v39 = vlaneseq }
  0x14   :  { %155 = vmatprep.mubr.f32.mxu1 %v1516_v0  ;;  %591 = vmatprep.mubr.f32.mxu0 %v1516_v0  ;;  %v205_v2 = vld [vmem:[#allocation2 + $0x8] sm:$0xff]  ;;  %v60_v3 = vcombine.high %v46_v1, %v46_v1  ;;  %v207_v4 = vld [vmem:[#allocation2 + $0x18] sm:$0xff]  ;;  %v204_v5 = vld [vmem:[#allocation2] sm:$0xff]  ;;  %vm61_vm1 = vcmask 23552   ;;  %vm220_vm2 = vcmask 523264   ;;  %vm1519_vm3 = vmmov 0  }
  0x15   :  { %v206_v6 = vld [vmem:[#allocation2 + $0x10] sm:$0xff]  ;;  %v38_v7 = vld [vmem:[%s1817_s0] sm:$0xff]  ;;  %v1576_v8 = vpack.c.bf16 %v207_v4, %v205_v2  ;;  %v209_v10 = vld [vmem:[#allocation2 + $0x28] sm:$0xff]  ;;  %v50_v42 = vshrl.u32 %v49_v39, 7 }
  0x16   :  { %v1578_v9 = vpack.c.bf16 %v206_v6, %v204_v5  ;;  %1133 = vmatprep.subr.msk.mxu1 %vm86_vm0, %v60_v3  ;;  %v211_v11 = vld [vmem:[#allocation2 + $0x38] sm:$0xff]  ;;  %v208_v12 = vld [vmem:[#allocation2 + $0x20] sm:$0xff]  ;;  %v210_v13 = vld [vmem:[#allocation2 + $0x30] sm:$0xff] }
  0x17   :  { %1134 = vmatpush1.msk.msra.mxu1 %vm86_vm0, %v46_v1  ;;  %v1580_v14 = vpack.c.bf16 %v211_v11, %v209_v10  ;;  %v213_v15 = vld [vmem:[#allocation2 + $0x48] sm:$0xff]  ;;  %1253 = vmatprep.subr.bf16.mxu0 %v1576_v8  ;;  %v215_v16 = vld [vmem:[#allocation2 + $0x58] sm:$0xff]  ;;  %v1590_v18 = vpack.c.bf16 %v210_v13, %v208_v12  ;;  %v212_v20 = vld [vmem:[#allocation2 + $0x40] sm:$0xff]  ;;  %v51_v45 = vsub.s32 0, %v50_v42  ;;  %v55_v47 = vsub.s32 1, %v50_v42 }
  0x18   :  { %1135 = vmatmul.mubr.msk.f32.vlgmr.msra.gmra.mrb[0].mxu1 %vm61_vm1, %v38_v7  ;;  %1205 = vmatprep.subr.bf16.mxu1 %v1576_v8  ;;  %v39_v17 = vld [vmem:[%s1817_s0 + $0x8] sm:$0xff]  ;;  %v1593_v19 = vpack.c.bf16 %v215_v16, %v213_v15  ;;  %v214_v21 = vld [vmem:[#allocation2 + $0x50] sm:$0xff]  ;;  %v219_v23 = vld [vmem:[#allocation2 + $0x78] sm:$0xff] }
  0x19   :  { %1207 = vmatpush1.bf16.msra.mxu1 %v1578_v9  ;;  %161 = vmatprep.mubr.f32.mxu1 %v1516_v0  ;;  %v217_v22 = vld [vmem:[#allocation2 + $0x68] sm:$0xff]  ;;  %v40_v24 = vld [vmem:[%s1817_s0 + $0x10] sm:$0xff]  ;;  %v1603_v25 = vpack.c.bf16 %v214_v21, %v212_v20  ;;  %v216_v27 = vld [vmem:[#allocation2 + $0x60] sm:$0xff] }
  0x1a   :  { %1209 = vmatprep.subr.bf16.mxu1 %v1580_v14  ;;  %1255 = vmatpush1.bf16.msra.mxu0 %v1578_v9  ;;  %v1606_v26 = vpack.c.bf16 %v219_v23, %v217_v22  ;;  %v218_v28 = vld [vmem:[#allocation2 + $0x70] sm:$0xff]  ;;  %v41_v29 = vld [vmem:[%s1817_s0 + $0x18] sm:$0xff]  ;;  %v42_v31 = vld [vmem:[%s1817_s0 + $0x20] sm:$0xff] }
  0x1b   :  { %1257 = vmatprep.subr.bf16.mxu0 %v1580_v14  ;;  %v1616_v30 = vpack.c.bf16 %v218_v28, %v216_v27  ;;  %v43_v32 = vld [vmem:[%s1817_s0 + $0x28] sm:$0xff]  ;;  %v44_v33 = vld [vmem:[%s1817_s0 + $0x30] sm:$0xff]  ;;  %v45_v34 = vld [vmem:[%s1817_s0 + $0x38] sm:$0xff] }
  0x1c   :  { %1136 = vmatmul.mubr.msk.f32.gmra.mrb[2].mxu1 %vm61_vm1, %v39_v17  ;;  %v47_v46 = vld [vmem:[%s1820_s3] sm:$0x3]  ;;  %s1517_s3 = smov 64  }
  0x1d   :  { %167 = vmatprep.mubr.f32.mxu1 %v1516_v0  ;;  %1211 = vmatpush1.bf16.msra.mxu1 %v1590_v18  ;;  %v1680_v50 = vrot.slane %v47_v46, %v51_v45  ;;  %v1682_v51 = vrot.slane %v47_v46, %v55_v47 }
  0x1e   :  { %1213 = vmatprep.subr.bf16.mxu1 %v1593_v19  ;;  %1259 = vmatpush1.bf16.msra.mxu0 %v1590_v18 }
  0x1f   :  { %1261 = vmatprep.subr.bf16.mxu0 %v1593_v19 }
  0x20   :  { %1137 = vmatmul.mubr.msk.f32.gmra.mrb[4].mxu1 %vm61_vm1, %v40_v24 }
  0x21   :  { %173 = vmatprep.mubr.f32.mxu1 %v1516_v0  ;;  %1215 = vmatpush1.bf16.msra.mxu1 %v1603_v25 }
  0x22   :  { %1217 = vmatprep.subr.bf16.mxu1 %v1606_v26  ;;  %1263 = vmatpush1.bf16.msra.mxu0 %v1603_v25 }
  0x23   :  { %1265 = vmatprep.subr.bf16.mxu0 %v1606_v26 }
  0x24   :  { %1138 = vmatmul.mubr.msk.f32.gmra.mrb[6].mxu1 %vm61_vm1, %v41_v29 }
  0x25   :  { %179 = vmatprep.mubr.f32.mxu1 %v1516_v0  ;;  %1219 = vmatpush1.bf16.msra.mxu1 %v1616_v30 }
  0x26   :  { %1221 = vmatprep.subr.bf16.mxu1 %v1576_v8  ;;  %1267 = vmatpush1.bf16.msra.mxu0 %v1616_v30 }
  0x27   :  { %1269 = vmatprep.subr.bf16.mxu0 %v1576_v8 }
  0x28   :  { %1139 = vmatmul.mubr.msk.f32.gmra.mrb[8].mxu1 %vm61_vm1, %v42_v31 }
  0x29   :  { %185 = vmatprep.mubr.f32.mxu1 %v1516_v0 }
  0x2c   :  { %1140 = vmatmul.mubr.msk.f32.gmra.mrb[10].mxu1 %vm61_vm1, %v43_v32 }
  0x2d   :  { %191 = vmatprep.mubr.f32.mxu1 %v1516_v0 }
  0x30   :  { %1141 = vmatmul.mubr.msk.f32.gmra.mrb[12].mxu1 %vm61_vm1, %v44_v33 }
  0x31   :  { %197 = vmatprep.mubr.f32.mxu1 %v1516_v0 }
  0x34   :  { %1142 = vmatmul.mubr.msk.f32.gmra.mrb[14].mxu1 %vm61_vm1, %v45_v34 }
  0x35   :  { %288 = vmatprep.mubr.f32.mxu1 %v1516_v0 }
  0x38   :  { %289 = vmatmul.mubr.f32.vlgmr.msra.gmra.mrb[0].mxu1 %v1516_v0 }
  0x39   :  { %1223 = vmatpush1.bf16.msra.mxu1 %v1578_v9  ;;  %389 = vmatprep.mubr.f32.mxu1 %v1516_v0 }
  0x3a   :  { %1225 = vmatprep.subr.bf16.mxu1 %v1580_v14 }
  0x3d   :  { %1227 = vmatpush1.bf16.msra.mxu1 %v1590_v18 }
  0x3e   :  { %1229 = vmatprep.subr.bf16.mxu1 %v1593_v19 }
  0x41   :  { %1231 = vmatpush1.bf16.msra.mxu1 %v1603_v25 }
  0x42   :  { %1233 = vmatprep.subr.bf16.mxu1 %v1606_v26 }
  0x45   :  { %1235 = vmatpush1.bf16.msra.mxu1 %v1616_v30 }
  0x46   :  { %1237 = vmatprep.subr.bf16.mxu1 %v1576_v8 }
  0xf7   :  { %v1657_v35 = vpop.f32.mrb[6].mxu1 }
  0xf8   :  { %v1659_v36 = vpop.f32.mrb[7].mxu1 }
  0xfb   :  { %v1661_v37 = vpop.f32.mrb[8].mxu1 }
  0xfc   :  { %v1663_v38 = vpop.f32.mrb[9].mxu1 }
  0xff   :  { %v1665_v40 = vpop.f32.mrb[10].mxu1 }
 0x100   :  { %v1667_v41 = vpop.f32.mrb[11].mxu1 }
 0x103   :  { %v1669_v43 = vpop.f32.mrb[12].mxu1 }
 0x104   :  { %v1671_v44 = vpop.f32.mrb[13].mxu1 }
 0x107   :  { %v1676_v48 = vpop.f32.mrb[14].mxu1 }
 0x108   :  { %v1678_v49 = vpop.f32.mrb[15].mxu1 }
 0x10b   :  { %v290_v52 = vpop.f32.mrb[0].mxu1 }
 0x10c   :  { %v1344_v53 = vadd.f32 %v290_v52, %v1680_v50  ;;  %v292_v54 = vpop.f32.mrb[1].mxu1 }
 0x10d   :  { %v1345_v55 = vadd.f32 %v292_v54, %v1682_v51 }
 0x10e   :  { %v1143_v56 = vmul.f32 -1.442695, %v1344_v53 }
 0x10f   :  { %v1144_v57 = vmul.f32 -1.442695, %v1345_v55 }
 0x110   :  { %1385 = vpow2.f32 %v1143_v56 }
 0x111   :  { %1387 = vpow2.f32 %v1144_v57 }
 0x11a   :  { %v1386_v58 = vpop.eup %1385 }
 0x11b   :  { %v1388_v59 = vpop.eup %1387  ;;  %v303_v61 = vadd.f32 1.0, %v1386_v58 }
 0x11c   :  { %v304_v60 = vadd.f32 1.0, %v1388_v59 }
 0x11e   :  { %1389 = vrcp.f32 %v304_v60 }
 0x11f   :  { %1391 = vrcp.f32 %v303_v61 }
 0x128   :  { %v1390_v62 = vpop.eup %1389 }
 0x129   :  { %v309_v63 = vmul.f32 2.0, %v1390_v62  ;;  %v1392_v2 = vpop.eup %1391 }
 0x12a   :  { %v311_v4 = vmul.f32 0.0, %v1392_v2 }
 0x12b   :  { %v1145_v1 = vadd.f32 -1.0, %v309_v63 }
 0x12d   :  { %v312_v3 = vmul.f32 %v1392_v2, %v1145_v1 }
 0x12f   :  { %314 = vrot.lane.b32.xlu0 %v312_v3, %s1517_s3 }
 0x1a1   :  { %v315_v5 = vpop.permute.xlu0 %314 }
 0x1a2   :  { %v317_v6 = vadd.f32 %v315_v5, %v311_v4 }
 0x1a4   :  { %1393 = vtanh.f32 %v317_v6 }
 0x1ae   :  { %v1394_v7 = vpop.eup %1393 }
 0x1af   :  { %v319_v10 = vmul.f32 %v1394_v7, %v1390_v62 }
 0x1b1   :  { %321 = vrot.lane.b32.xlu0 %v319_v10, %s1517_s3 }
 0x223   :  { %v322_v11 = vpop.permute.xlu0 %321 }
 0x224   :  { %1146 = vmatmul.mubr.msk.f32.vlgmr.msra.gmra.mrb[2].mxu1 %vm220_vm2, %v322_v11  ;;  %v176_v11 = vadd.f32 %v1657_v35, %v1680_v50 }
 0x225   :  { %1239 = vmatpush1.bf16.msra.mxu1 %v1578_v9  ;;  %490 = vmatprep.mubr.f32.mxu1 %v1516_v0 }
 0x226   :  { %1241 = vmatprep.subr.bf16.mxu1 %v1580_v14 }
 0x229   :  { %1243 = vmatpush1.bf16.msra.mxu1 %v1590_v18 }
 0x22a   :  { %1245 = vmatprep.subr.bf16.mxu1 %v1593_v19 }
 0x22d   :  { %1247 = vmatpush1.bf16.msra.mxu1 %v1603_v25 }
 0x22e   :  { %1249 = vmatprep.subr.bf16.mxu1 %v1606_v26 }
 0x231   :  { %1251 = vmatpush1.bf16.msra.mxu1 %v1616_v30 }
 0x2f7   :  { %v391_v12 = vpop.f32.mrb[2].mxu1 }
 0x2f8   :  { %v1346_v13 = vadd.f32 %v391_v12, %v1680_v50  ;;  %v393_v15 = vpop.f32.mrb[3].mxu1  ;;  %v178_v12 = vadd.f32 %v1659_v36, %v1682_v51 }
 0x2f9   :  { %v1347_v16 = vadd.f32 %v393_v15, %v1682_v51 }
 0x2fa   :  { %v1147_v17 = vmul.f32 -1.442695, %v1346_v13 }
 0x2fb   :  { %v1148_v20 = vmul.f32 -1.442695, %v1347_v16 }
 0x2fc   :  { %1395 = vpow2.f32 %v1147_v17 }
 0x2fd   :  { %1397 = vpow2.f32 %v1148_v20 }
 0x306   :  { %v1396_v21 = vpop.eup %1395 }
 0x307   :  { %v1398_v22 = vpop.eup %1397  ;;  %v404_v24 = vadd.f32 1.0, %v1396_v21 }
 0x308   :  { %v405_v23 = vadd.f32 1.0, %v1398_v22 }
 0x30a   :  { %1399 = vrcp.f32 %v405_v23 }
 0x30b   :  { %1401 = vrcp.f32 %v404_v24 }
 0x314   :  { %v1400_v27 = vpop.eup %1399 }
 0x315   :  { %v410_v28 = vmul.f32 2.0, %v1400_v27  ;;  %v1402_v31 = vpop.eup %1401 }
 0x316   :  { %v412_v33 = vmul.f32 %v1402_v31, %v317_v6 }
 0x317   :  { %v1149_v29 = vadd.f32 -1.0, %v410_v28 }
 0x319   :  { %v413_v32 = vmul.f32 %v1402_v31, %v1149_v29 }
 0x31b   :  { %415 = vrot.lane.b32.xlu1 %v413_v32, %s1517_s3 }
 0x38d   :  { %v416_v34 = vpop.permute.xlu1 %415 }
 0x38e   :  { %v418_v39 = vadd.f32 %v416_v34, %v412_v33 }
 0x390   :  { %1403 = vtanh.f32 %v418_v39 }
 0x39a   :  { %v1404_v42 = vpop.eup %1403 }
 0x39b   :  { %v420_v45 = vmul.f32 %v1404_v42, %v1400_v27 }
 0x39d   :  { %422 = vrot.lane.b32.xlu1 %v420_v45, %s1517_s3 }
 0x40f   :  { %v423_v46 = vpop.permute.xlu1 %422 }
 0x410   :  { %1150 = vmatmul.mubr.msk.f32.vlgmr.msra.gmra.mrb[4].mxu1 %vm220_vm2, %v423_v46  ;;  %v182_v46 = vadd.f32 %v1661_v37, %v1680_v50 }
 0x411   :  { %1201 = vmatprep.mubr.msk.f32.mxu1 %vm1519_vm3, %v1516_v0 }
 0x4e3   :  { %v492_v47 = vpop.f32.mrb[4].mxu1 }
 0x4e4   :  { %v1348_v52 = vadd.f32 %v492_v47, %v1680_v50  ;;  %v494_v53 = vpop.f32.mrb[5].mxu1  ;;  %v184_v47 = vadd.f32 %v1663_v38, %v1682_v51 }
 0x4e5   :  { %v1349_v54 = vadd.f32 %v494_v53, %v1682_v51 }
 0x4e6   :  { %v1151_v55 = vmul.f32 -1.442695, %v1348_v52 }
 0x4e7   :  { %v1152_v56 = vmul.f32 -1.442695, %v1349_v54 }
 0x4e8   :  { %1405 = vpow2.f32 %v1151_v55 }
 0x4e9   :  { %1407 = vpow2.f32 %v1152_v56 }
 0x4f2   :  { %v1406_v57 = vpop.eup %1405 }
 0x4f3   :  { %v1408_v58 = vpop.eup %1407  ;;  %v505_v60 = vadd.f32 1.0, %v1406_v57 }
 0x4f4   :  { %v506_v59 = vadd.f32 1.0, %v1408_v58 }
 0x4f6   :  { %1409 = vrcp.f32 %v506_v59 }
 0x4f7   :  { %1411 = vrcp.f32 %v505_v60 }
 0x500   :  { %v1410_v61 = vpop.eup %1409 }
 0x501   :  { %v511_v62 = vmul.f32 2.0, %v1410_v61  ;;  %v1412_v1 = vpop.eup %1411 }
 0x502   :  { %v513_v3 = vmul.f32 %v1412_v1, %v418_v39 }
 0x503   :  { %v1153_v63 = vadd.f32 -1.0, %v511_v62 }
 0x505   :  { %v514_v2 = vmul.f32 %v1412_v1, %v1153_v63 }
 0x507   :  { %516 = vrot.lane.b32.xlu0 %v514_v2, %s1517_s3 }
 0x579   :  { %v517_v4 = vpop.permute.xlu0 %516 }
 0x57a   :  { %v519_v5 = vadd.f32 %v517_v4, %v513_v3 }
 0x57c   :  { %1413 = vtanh.f32 %v519_v5 }
 0x586   :  { %v1414_v6 = vpop.eup %1413 }
 0x587   :  { %v521_v7 = vmul.f32 %v1414_v6, %v1410_v61 }
 0x589   :  { %523 = vrot.lane.b32.xlu1 %v521_v7, %s1517_s3 }
 0x5fb   :  { %v524_v10 = vpop.permute.xlu1 %523 }
 0x5fc   :  { %1154 = vmatmul.mubr.msk.f32.vlgmr.msra.gmra.mrb[0].mxu0 %vm220_vm2, %v524_v10  ;;  %v188_v10 = vadd.f32 %v1665_v40, %v1680_v50 }
 0x5fd   :  { %1271 = vmatpush1.bf16.msra.mxu0 %v1578_v9  ;;  %692 = vmatprep.mubr.f32.mxu0 %v1516_v0 }
 0x5fe   :  { %1273 = vmatprep.subr.bf16.mxu0 %v1580_v14 }
 0x601   :  { %1275 = vmatpush1.bf16.msra.mxu0 %v1590_v18 }
 0x602   :  { %1277 = vmatprep.subr.bf16.mxu0 %v1593_v19 }
 0x605   :  { %1279 = vmatpush1.bf16.msra.mxu0 %v1603_v25 }
 0x606   :  { %1281 = vmatprep.subr.bf16.mxu0 %v1606_v26 }
 0x609   :  { %1283 = vmatpush1.bf16.msra.mxu0 %v1616_v30 }
 0x60a   :  { %1285 = vmatprep.subr.bf16.mxu0 %v1576_v8 }
 0x6cf   :  { %v593_v13 = vpop.f32.mrb[0].mxu0 }
 0x6d0   :  { %v598_v15 = vadd.f32 %v593_v13, %v176_v11  ;;  %v595_v16 = vpop.f32.mrb[1].mxu0  ;;  %v190_v11 = vadd.f32 %v1667_v41, %v1682_v51 }
 0x6d1   :  { %v599_v17 = vadd.f32 %v595_v16, %v178_v12 }
 0x6d2   :  { %v1155_v20 = vmul.f32 -1.442695, %v598_v15 }
 0x6d3   :  { %v1156_v21 = vmul.f32 -1.442695, %v599_v17 }
 0x6d4   :  { %1415 = vpow2.f32 %v1155_v20 }
 0x6d5   :  { %1417 = vpow2.f32 %v1156_v21 }
 0x6de   :  { %v1416_v22 = vpop.eup %1415 }
 0x6df   :  { %v1418_v23 = vpop.eup %1417  ;;  %v606_v27 = vadd.f32 1.0, %v1416_v22 }
 0x6e0   :  { %v607_v24 = vadd.f32 1.0, %v1418_v23 }
 0x6e2   :  { %1419 = vrcp.f32 %v607_v24 }
 0x6e3   :  { %1421 = vrcp.f32 %v606_v27 }
 0x6ec   :  { %v1420_v28 = vpop.eup %1419 }
 0x6ed   :  { %v612_v29 = vmul.f32 2.0, %v1420_v28  ;;  %v1422_v31 = vpop.eup %1421 }
 0x6ee   :  { %v614_v36 = vmul.f32 %v1422_v31, %v519_v5 }
 0x6ef   :  { %v1157_v35 = vadd.f32 -1.0, %v612_v29 }
 0x6f1   :  { %v615_v32 = vmul.f32 %v1422_v31, %v1157_v35 }
 0x6f3   :  { %617 = vrot.lane.b32.xlu0 %v615_v32, %s1517_s3 }
 0x765   :  { %v618_v33 = vpop.permute.xlu0 %617 }
 0x766   :  { %v620_v34 = vadd.f32 %v618_v33, %v614_v36 }
 0x768   :  { %1423 = vtanh.f32 %v620_v34 }
 0x772   :  { %v1424_v39 = vpop.eup %1423 }
 0x773   :  { %v622_v42 = vmul.f32 %v1424_v39, %v1420_v28 }
 0x775   :  { %624 = vrot.lane.b32.xlu1 %v622_v42, %s1517_s3 }
 0x7e7   :  { %v625_v45 = vpop.permute.xlu1 %624 }
 0x7e8   :  { %1158 = vmatmul.mubr.msk.f32.vlgmr.msra.gmra.mrb[2].mxu0 %vm220_vm2, %v625_v45 }
 0x7e9   :  { %1287 = vmatpush1.bf16.msra.mxu0 %v1578_v9  ;;  %793 = vmatprep.mubr.f32.mxu0 %v1516_v0 }
 0x7ea   :  { %1289 = vmatprep.subr.bf16.mxu0 %v1580_v14 }
 0x7ed   :  { %1291 = vmatpush1.bf16.msra.mxu0 %v1590_v18 }
 0x7ee   :  { %1293 = vmatprep.subr.bf16.mxu0 %v1593_v19 }
 0x7f1   :  { %1295 = vmatpush1.bf16.msra.mxu0 %v1603_v25 }
 0x7f2   :  { %1297 = vmatprep.subr.bf16.mxu0 %v1606_v26 }
 0x7f5   :  { %1299 = vmatpush1.bf16.msra.mxu0 %v1616_v30 }
 0x7f6   :  { %1301 = vmatprep.subr.bf16.mxu0 %v1576_v8 }
 0x8bb   :  { %v694_v52 = vpop.f32.mrb[2].mxu0 }
 0x8bc   :  { %v699_v53 = vadd.f32 %v694_v52, %v182_v46  ;;  %v696_v54 = vpop.f32.mrb[3].mxu0 }
 0x8bd   :  { %v700_v55 = vadd.f32 %v696_v54, %v184_v47 }
 0x8be   :  { %v1159_v56 = vmul.f32 -1.442695, %v699_v53 }
 0x8bf   :  { %v1160_v57 = vmul.f32 -1.442695, %v700_v55 }
 0x8c0   :  { %1425 = vpow2.f32 %v1159_v56 }
 0x8c1   :  { %1427 = vpow2.f32 %v1160_v57 }
 0x8ca   :  { %v1426_v58 = vpop.eup %1425 }
 0x8cb   :  { %v1428_v59 = vpop.eup %1427  ;;  %v707_v61 = vadd.f32 1.0, %v1426_v58 }
 0x8cc   :  { %v708_v60 = vadd.f32 1.0, %v1428_v59 }
 0x8ce   :  { %1429 = vrcp.f32 %v708_v60  ;;  %v200_v60 = vadd.f32 %v1676_v48, %v1680_v50 }
 0x8cf   :  { %1431 = vrcp.f32 %v707_v61  ;;  %v202_v61 = vadd.f32 %v1678_v49, %v1682_v51  ;;  %v1027_v49 = vld [vmem:[%s1821_s4] sm:$0xff] }
 0x8d8   :  { %v1430_v62 = vpop.eup %1429 }
 0x8d9   :  { %v713_v63 = vmul.f32 2.0, %v1430_v62  ;;  %v1432_v1 = vpop.eup %1431 }
 0x8da   :  { %v715_v38 = vmul.f32 %v1432_v1, %v620_v34  ;;  %v194_v34 = vadd.f32 %v1669_v43, %v1680_v50 }
 0x8db   :  { %v1161_v37 = vadd.f32 -1.0, %v713_v63 }
 0x8dd   :  { %v716_v2 = vmul.f32 %v1432_v1, %v1161_v37 }
 0x8df   :  { %718 = vrot.lane.b32.xlu0 %v716_v2, %s1517_s3 }
 0x951   :  { %v719_v3 = vpop.permute.xlu0 %718 }
 0x952   :  { %v721_v4 = vadd.f32 %v719_v3, %v715_v38 }
 0x954   :  { %1433 = vtanh.f32 %v721_v4 }
 0x95e   :  { %v1434_v5 = vpop.eup %1433 }
 0x95f   :  { %v723_v6 = vmul.f32 %v1434_v5, %v1430_v62 }
 0x961   :  { %725 = vrot.lane.b32.xlu1 %v723_v6, %s1517_s3 }
 0x9d3   :  { %v726_v7 = vpop.permute.xlu1 %725 }
 0x9d4   :  { %1162 = vmatmul.mubr.msk.f32.vlgmr.msra.gmra.mrb[4].mxu0 %vm220_vm2, %v726_v7 }
 0x9d5   :  { %1303 = vmatpush1.bf16.msra.mxu0 %v1578_v9  ;;  %894 = vmatprep.mubr.f32.mxu0 %v1516_v0 }
 0x9d6   :  { %1305 = vmatprep.subr.bf16.mxu0 %v1580_v14 }
 0x9d9   :  { %1307 = vmatpush1.bf16.msra.mxu0 %v1590_v18 }
 0x9da   :  { %1309 = vmatprep.subr.bf16.mxu0 %v1593_v19 }
 0x9dd   :  { %1311 = vmatpush1.bf16.msra.mxu0 %v1603_v25 }
 0x9de   :  { %1313 = vmatprep.subr.bf16.mxu0 %v1606_v26 }
 0x9e1   :  { %1315 = vmatpush1.bf16.msra.mxu0 %v1616_v30 }
 0x9e2   :  { %1317 = vmatprep.subr.bf16.mxu0 %v1576_v8 }
 0xaa7   :  { %v795_v12 = vpop.f32.mrb[4].mxu0 }
 0xaa8   :  { %v800_v13 = vadd.f32 %v795_v12, %v188_v10  ;;  %v797_v15 = vpop.f32.mrb[5].mxu0  ;;  %v1029_v12 = vld [vmem:[%s1821_s4 + $0x10] sm:$0xff] }
 0xaa9   :  { %v801_v16 = vadd.f32 %v797_v15, %v190_v11 }
 0xaaa   :  { %v1163_v17 = vmul.f32 -1.442695, %v800_v13  ;;  %v1518_v13 = vmov 0.0|0.0  }
 0xaab   :  { %v1164_v20 = vmul.f32 -1.442695, %v801_v16  ;;  %1332 = vmatprep.subr.bf16.mxu1 %v1518_v13  ;;  %v1030_v16 = vld [vmem:[%s1821_s4 + $0x18] sm:$0xff] }
 0xaac   :  { %1435 = vpow2.f32 %v1163_v17  ;;  %v1336_v17 = vpack.c.bf16 %v1030_v16, %v1029_v12 }
 0xaad   :  { %1437 = vpow2.f32 %v1164_v20  ;;  %v1031_v20 = vld [vmem:[%s1821_s4 + $0x20] sm:$0xff] }
 0xab6   :  { %v1436_v21 = vpop.eup %1435 }
 0xab7   :  { %v1438_v22 = vpop.eup %1437  ;;  %v808_v24 = vadd.f32 1.0, %v1436_v21  ;;  %v1032_v21 = vld [vmem:[%s1821_s4 + $0x28] sm:$0xff] }
 0xab8   :  { %v809_v23 = vadd.f32 1.0, %v1438_v22  ;;  %v1339_v22 = vpack.c.bf16 %v1032_v21, %v1031_v20 }
 0xaba   :  { %1439 = vrcp.f32 %v809_v23  ;;  %v1033_v23 = vld [vmem:[%s1821_s4 + $0x30] sm:$0xff] }
 0xabb   :  { %1441 = vrcp.f32 %v808_v24 }
 0xac4   :  { %v1440_v8 = vpop.eup %1439 }
 0xac5   :  { %v814_v27 = vmul.f32 2.0, %v1440_v8  ;;  %v1442_v28 = vpop.eup %1441 }
 0xac6   :  { %v816_v41 = vmul.f32 %v1442_v28, %v721_v4 }
 0xac7   :  { %v1165_v40 = vadd.f32 -1.0, %v814_v27 }
 0xac9   :  { %v817_v29 = vmul.f32 %v1442_v28, %v1165_v40 }
 0xacb   :  { %819 = vrot.lane.b32.xlu0 %v817_v29, %s1517_s3 }
 0xb3d   :  { %v820_v35 = vpop.permute.xlu0 %819 }
 0xb3e   :  { %v822_v31 = vadd.f32 %v820_v35, %v816_v41  ;;  %v1174_v35 = vld [vmem:[%s1822_s5] ss:$0 sm:$0xff] }
 0xb40   :  { %1443 = vtanh.f32 %v822_v31 }
 0xb4a   :  { %v1444_v32 = vpop.eup %1443 }
 0xb4b   :  { %v824_v36 = vmul.f32 %v1444_v32, %v1440_v8 }
 0xb4d   :  { %826 = vrot.lane.b32.xlu1 %v824_v36, %s1517_s3 }
 0xbbf   :  { %v827_v33 = vpop.permute.xlu1 %826 }
 0xbc0   :  { %1166 = vmatmul.mubr.msk.f32.vlgmr.msra.gmra.mrb[6].mxu0 %vm220_vm2, %v827_v33 }
 0xbc1   :  { %1319 = vmatpush1.bf16.msra.mxu0 %v1578_v9  ;;  %995 = vmatprep.mubr.f32.mxu0 %v1516_v0  ;;  %v196_v9 = vadd.f32 %v1671_v44, %v1682_v51  ;;  %v1028_v51 = vld [vmem:[%s1821_s4 + $0x8] sm:$0xff]  ;;  %v1034_v0 = vld [vmem:[%s1821_s4 + $0x38] sm:$0xff]  ;;  %s1520_s4 = smov [#allocation5]  }
 0xbc2   :  { %1321 = vmatprep.subr.bf16.mxu0 %v1580_v14  ;;  %v1333_v15 = vpack.c.bf16 %v1028_v51, %v1027_v49  ;;  %v1342_v24 = vpack.c.bf16 %v1034_v0, %v1033_v23  ;;  %s1124_s20 = sshll.u32 %s1520_s4, 4  ;;  %s1125_s20 = int_to_ptr.vmem [resolvable:$true] %s1124_s20 }
 0xbc3   :  { %s1487_s21 = scalar_lea.vmem %s1125_s20, 128  ;;  %p1492_p9 = scmp.lt.s32.totalorder %s1125_s20, %s1125_s20 }
 0xbc4   :  { %1334 = vmatpush3.bf16.msra.mxu1 %v1333_v15  ;;  %p1488_p8 = scmp.ne.s32.totalorder %s1125_s20, %s1487_s21  ;;  %p1493_p10 = scmp.lt.s32.totalorder %s1487_s21, %s1487_s21 }
 0xbc5   :  { %1323 = vmatpush1.bf16.msra.mxu0 %v1590_v18  ;;  %1335 = vmatprep.subr.bf16.mxu1 %v1518_v13 }
 0xbc6   :  { %1325 = vmatprep.subr.bf16.mxu0 %v1593_v19  ;;  %p1494_p11 = por %p1493_p10, %p1492_p9 }
 0xbc8   :  { %1337 = vmatpush3.bf16.msra.mxu1 %v1336_v17  ;;  %p1495_p12 = pnand %p1494_p11, %p1488_p8 }
 0xbc9   :  { %1327 = vmatpush1.bf16.msra.mxu0 %v1603_v25  ;;  %1338 = vmatprep.subr.bf16.mxu1 %v1518_v13 }
 0xbca   :  { %1329 = vmatprep.subr.bf16.mxu0 %v1606_v26 }
 0xbcc   :  { %1340 = vmatpush3.bf16.msra.mxu1 %v1339_v22 }
 0xbcd   :  { %1331 = vmatpush1.bf16.msra.mxu0 %v1616_v30  ;;  %1341 = vmatprep.subr.bf16.mxu1 %v1518_v13 }
 0xbd0   :  { %1343 = vmatpush3.bf16.msra.mxu1 %v1342_v24 }
 0xc93   :  { %v896_v39 = vpop.f32.mrb[6].mxu0 }
 0xc94   :  { %v901_v42 = vadd.f32 %v896_v39, %v194_v34  ;;  %v898_v45 = vpop.f32.mrb[7].mxu0 }
 0xc95   :  { %v902_v14 = vadd.f32 %v898_v45, %v196_v9 }
 0xc96   :  { %v1167_v46 = vmul.f32 -1.442695, %v901_v42 }
 0xc97   :  { %v1168_v18 = vmul.f32 -1.442695, %v902_v14 }
 0xc98   :  { %1445 = vpow2.f32 %v1167_v46 }
 0xc99   :  { %1447 = vpow2.f32 %v1168_v18 }
 0xca2   :  { %v1446_v19 = vpop.eup %1445 }
 0xca3   :  { %v1448_v25 = vpop.eup %1447  ;;  %v909_v26 = vadd.f32 1.0, %v1446_v19 }
 0xca4   :  { %v910_v47 = vadd.f32 1.0, %v1448_v25 }
 0xca6   :  { %1449 = vrcp.f32 %v910_v47 }
 0xca7   :  { %1451 = vrcp.f32 %v909_v26 }
 0xcb0   :  { %v1450_v30 = vpop.eup %1449 }
 0xcb1   :  { %v915_v52 = vmul.f32 2.0, %v1450_v30  ;;  %v1452_v53 = vpop.eup %1451 }
 0xcb2   :  { %v917_v44 = vmul.f32 %v1452_v53, %v822_v31 }
 0xcb3   :  { %v1169_v43 = vadd.f32 -1.0, %v915_v52 }
 0xcb5   :  { %v918_v54 = vmul.f32 %v1452_v53, %v1169_v43 }
 0xcb7   :  { %920 = vrot.lane.b32.xlu0 %v918_v54, %s1517_s3 }
 0xd29   :  { %v921_v55 = vpop.permute.xlu0 %920 }
 0xd2a   :  { %v923_v56 = vadd.f32 %v921_v55, %v917_v44 }
 0xd2c   :  { %1453 = vtanh.f32 %v923_v56 }
 0xd36   :  { %v1454_v57 = vpop.eup %1453 }
 0xd37   :  { %v925_v58 = vmul.f32 %v1454_v57, %v1450_v30 }
 0xd39   :  { %927 = vrot.lane.b32.xlu1 %v925_v58, %s1517_s3 }
 0xdab   :  { %v928_v59 = vpop.permute.xlu1 %927 }
 0xdac   :  { %1170 = vmatmul.mubr.msk.f32.vlgmr.msra.gmra.mrb[8].mxu0 %vm220_vm2, %v928_v59 }
 0xe7f   :  { %v997_v62 = vpop.f32.mrb[8].mxu0 }
 0xe80   :  { %v1002_v63 = vadd.f32 %v997_v62, %v200_v60  ;;  %v999_v37 = vpop.f32.mrb[9].mxu0 }
 0xe81   :  { %v1003_v1 = vadd.f32 %v999_v37, %v202_v61 }
 0xe82   :  { %v1171_v2 = vmul.f32 -1.442695, %v1002_v63 }
 0xe83   :  { %v1172_v38 = vmul.f32 -1.442695, %v1003_v1 }
 0xe84   :  { %1455 = vpow2.f32 %v1171_v2 }
 0xe85   :  { %1457 = vpow2.f32 %v1172_v38 }
 0xe8e   :  { %v1456_v3 = vpop.eup %1455 }
 0xe8f   :  { %v1458_v4 = vpop.eup %1457  ;;  %v1010_v6 = vadd.f32 1.0, %v1456_v3 }
 0xe90   :  { %v1011_v5 = vadd.f32 1.0, %v1458_v4 }
 0xe92   :  { %1459 = vrcp.f32 %v1011_v5 }
 0xe93   :  { %1461 = vrcp.f32 %v1010_v6 }
 0xe9c   :  { %v1460_v7 = vpop.eup %1459 }
 0xe9d   :  { %v1016_v10 = vmul.f32 2.0, %v1460_v7  ;;  %v1462_v50 = vpop.eup %1461 }
 0xe9e   :  { %v1018_v8 = vmul.f32 %v1462_v50, %v923_v56 }
 0xe9f   :  { %v1173_v48 = vadd.f32 -1.0, %v1016_v10 }
 0xea1   :  { %v1019_v11 = vmul.f32 %v1462_v50, %v1173_v48 }
 0xea3   :  { %1021 = vrot.lane.b32.xlu0 %v1019_v11, %s1517_s3 }
 0xf15   :  { %v1022_v27 = vpop.permute.xlu0 %1021 }
 0xf16   :  { %v1024_v40 = vadd.f32 %v1022_v27, %v1018_v8 }
 0xf18   :  { %1463 = vtanh.f32 %v1024_v40 }
 0xf22   :  { %v1464_v28 = vpop.eup %1463 }
 0xf23   :  { %v1026_v29 = vmul.f32 %v1464_v28, %v1460_v7 }
 0xf25   :  { %1043 = vrot.lane.b32.xlu1 %v1026_v29, %s1517_s3 }
 0xf97   :  { %v1044_v41 = vpop.permute.xlu1 %1043 }
 0xf98   :  { %1202 = vmatmul.mubr.msk.f32.vlgmr.msra.gmra.mrb[16].mxu1 %vm220_vm2, %v1044_v41 }
0x106b   :  { %v1113_v31 = vpop.f32.mrb[16].mxu1 }
0x106c   :  { %v1114_v32 = vadd.f32 %v1174_v35, %v1113_v31  ;;  %v1203_v36 = vpop.f32.mrb[17].mxu1 }
0x106e   :  { %1117 = vst [vmem:[#allocation5] sm:$0xff] %v1114_v32 }
0x106f   :  { %1498 = shalt.err (!%p1495_p12)
}
0x1070   :  { %s1499_s24 = scalar_lea.hbm %s1823_s6, 128 }
0x1071   :  { %p1500_p13 = scmp.ne.s32.totalorder %s1823_s6, %s1499_s24  ;;  %p1503_p0 = scmp.lt.u32.totalorder %s1499_s24, %s1823_s6 }
0x1073   :  { %p1505_p1 = pnand %p1503_p0, %p1500_p13 }
0x1075   :  { %1508 = shalt.err (!%p1505_p1)
}
0x1076   :  { %1127 = dma.vmem_to_hbm [thread:$0]  %s1125_s20, 128, %s1823_s6, [#allocation4]  }
0x1077   :  { %1511 = dma.done.wait [#allocation4], 128  }
0x1078   :  { %1512 = vsyncadd [#allocation4], 4294967168 }
0x1079   :  { %1131 = vsyncpa [#allocation3], 1 }
0x107a   :  { %1132 = vsyncpa [#allocation4], 1 }

</bundles_post_ra>
